<compile_context>
chip_gen: v7x
topology: tpu7x:2x2x1
jax: 0.10.0
libtpu: 0.0.40
codegen_flags: <defaults>
</compile_context>

<pallas_src>
import jax
import jax.numpy as jnp
from jax.experimental import pallas as pl
from jax.experimental.pallas import tpu as pltpu

# ---- module-consistent toy sizes --------------------------------------------
B = 2          # batch
C = 4          # input channels (NCHW)
H = W = 16     # spatial
FEAT_DIM = 128         # stand-in for ResNet50 output_num() (2048 in real model)
BOTTLENECK_DIM = 32    # bottleneck_dim (256 in real model defaults)
CLASS_NUM = 31         # class_num default

# ---- lane-dense padded sizes -------------------------------------------------
K_IN = C * H * W       # 1024: contraction dim when the GAP is folded into dot #1
POOL_PAD = 128         # pooled-channel input padded to a full lane width
BOT_PAD = 128          # bottleneck padded to a full lane width
CLS_PAD = 128          # classes padded to a full lane width
OUT_PAD = BOT_PAD + 2 * CLS_PAD   # 384: feat | logits | softmax output slab
NEG = -1e30            # classifier-bias pad value -> exp() underflows to 0

SMALL_BATCH_ROWS = 256  # below this, use the wrapper-GAP latency path


def _round_up(x, m):
    return ((x + m - 1) // m) * m


def dann_kernel(x_ref, w0_ref, b0_ref, w1_ref, b1_ref, w12_ref, b12_ref, out_ref):
    """Fused: stand-in backbone -> bottleneck -> classifier -> softmax."""
    # stand-in base_network projection: bf16 MXU dot, f32 accumulate
    base_f32 = jnp.dot(x_ref[...], w0_ref[...],
                       preferred_element_type=jnp.float32) + b0_ref[...]
    base = base_f32.astype(jnp.bfloat16)

    # bottleneck_layer and the (pre-fused) classifier chain both read `base`,
    # so the two MXU dots are independent and push back-to-back.
    feat = jnp.dot(base, w1_ref[...],
                   preferred_element_type=jnp.float32) + b1_ref[...]    # (tm, BOT_PAD)
    logits = jnp.dot(base, w12_ref[...],
                     preferred_element_type=jnp.float32) + b12_ref[...]  # (tm, CLS_PAD)

    # nn.Softmax() over the class lanes; padded class columns carry bias NEG so
    # exp() underflows to exactly 0 and they vanish from the sum.
    m = jnp.max(logits, axis=-1, keepdims=True)
    e = jnp.exp(logits - m)
    sm = e / jnp.sum(e, axis=-1, keepdims=True)          # exact divide (parity)

    # single lane-dense output slab: [feat | logits | softmax]
    out_ref[...] = jnp.concatenate([feat, logits, sm], axis=-1)


def make_params(key):
    """Deterministic parameter init mirroring the module's __init__."""
    k0, k1, k2 = jax.random.split(key, 3)
    # stand-in backbone projection (deterministic, not from the module)
    w0 = (0.01 * jax.random.normal(k0, (C, FEAT_DIM))).astype(jnp.float32)
    b0 = jnp.zeros((1, FEAT_DIM), jnp.float32)
    # bottleneck_layer.weight ~ N(0, 0.005), bias = 0.1   (stored as (in, out))
    w1 = (0.005 * jax.random.normal(k1, (FEAT_DIM, BOTTLENECK_DIM))).astype(jnp.float32)
    b1 = jnp.full((1, BOTTLENECK_DIM), 0.1, jnp.float32)
    # classifier_layer.weight ~ N(0, 0.01), bias = 0.0    (stored as (in, out))
    w2 = (0.01 * jax.random.normal(k2, (BOTTLENECK_DIM, CLASS_NUM))).astype(jnp.float32)
    b2 = jnp.zeros((1, CLASS_NUM), jnp.float32)
    return w0, b0, w1, b1, w2, b2


def prepare_params(params):
    """One-time padding / GAP-fold / bf16 cast / classifier-chain fusion."""
    w0, b0, w1, b1, w2, b2 = params
    f32, bf16 = jnp.float32, jnp.bfloat16

    # small-batch path: GAP in the wrapper, w0 zero-padded C -> 128 sublanes
    w0_pool = jnp.zeros((POOL_PAD, FEAT_DIM), f32).at[:C].set(w0).astype(bf16)
    # large-batch path: GAP folded into dot #1 over the NCHW c-major flatten
    w0_gap = (jnp.repeat(w0, H * W, axis=0) / float(H * W)).astype(bf16)
    b0_p = b0.astype(f32)                                             # (1, FEAT_DIM)

    w1_p = jnp.zeros((FEAT_DIM, BOT_PAD), f32).at[:, :BOTTLENECK_DIM].set(w1)
    b1_p = jnp.zeros((1, BOT_PAD), f32).at[:, :BOTTLENECK_DIM].set(b1)
    w2_p = jnp.zeros((BOT_PAD, CLS_PAD), f32).at[:BOTTLENECK_DIM, :CLASS_NUM].set(w2)
    b2_p = jnp.zeros((1, CLS_PAD), f32).at[:, :CLASS_NUM].set(b2)

    # pre-fold bottleneck->classifier: logits = base @ w12 + b12
    w12_p = w1_p @ w2_p                                               # f32
    b12 = b1_p @ w2_p + b2_p
    b12_p = jnp.full((1, CLS_PAD), NEG, f32).at[:, :CLASS_NUM].set(b12[:, :CLASS_NUM])

    return dict(
        w0_pool=w0_pool, w0_gap=w0_gap, b0=b0_p,
        w1=w1_p.astype(bf16), b1=b1_p,
        w12=w12_p.astype(bf16), b12=b12_p,
    )


def dann_forward(x, prep):
    bx = x.shape[0]

    # ---- batch tiling: big tiles amortize per-step overhead; >=2 tiles when
    # the batch allows so both v7x TensorCores get work ------------------------
    b_pad = _round_up(max(bx, 8), 8)
    if b_pad <= 8:
        tm = b_pad
    else:
        tm = min(512, _round_up((b_pad + 1) // 2, 8))
    b_pad = _round_up(b_pad, tm)
    grid = (b_pad // tm,)

    # ---- input path selection -------------------------------------------------
    if b_pad < SMALL_BATCH_ROWS:
        # latency path: GAP in the wrapper, tiny (b_pad, 128) bf16 x tile and a
        # 32 KiB w0 instead of the 256x-expanded fused-GAP weight.
        pooled = jnp.mean(x, axis=(2, 3))                              # (bx, C) f32
        x_in = jnp.zeros((b_pad, POOL_PAD), jnp.bfloat16)
        x_in = x_in.at[:bx, :C].set(pooled.astype(jnp.bfloat16))
        w0_in = prep["w0_pool"]
        k_in = POOL_PAD
    else:
        # throughput path: x read from HBM exactly once inside the kernel, GAP
        # folded into dot #1; only the ragged tail is padded (fused with the cast).
        x_in = x.reshape(bx, K_IN).astype(jnp.bfloat16)
        if b_pad != bx:
            x_in = jnp.pad(x_in, ((0, b_pad - bx), (0, 0)))
        w0_in = prep["w0_gap"]
        k_in = K_IN

    # ---- scoped-VMEM check (only pass a limit if we exceed the v5e default) ---
    w_bytes = ((k_in * FEAT_DIM + FEAT_DIM * BOT_PAD + BOT_PAD * CLS_PAD) * 2
               + (FEAT_DIM + BOT_PAD + CLS_PAD) * 4)
    vmem_est = 2 * tm * k_in * 2 + 2 * tm * OUT_PAD * 4 + 2 * w_bytes
    vmem_limit = None
    if vmem_est > 12 * 1024 * 1024:
        vmem_limit = min(int(vmem_est * 1.5), 32 * 1024 * 1024)

    const = lambda i: (0, 0)          # weights stay resident across batch tiles
    out = pl.pallas_call(
        dann_kernel,
        grid=grid,
        in_specs=[
            pl.BlockSpec((tm, k_in), lambda i: (i, 0)),        # x tiles (bf16)
            pl.BlockSpec((k_in, FEAT_DIM), const),             # w0 (bf16)
            pl.BlockSpec((1, FEAT_DIM), const),                # b0 (f32)
            pl.BlockSpec((FEAT_DIM, BOT_PAD), const),          # w1 padded (bf16)
            pl.BlockSpec((1, BOT_PAD), const),                 # b1 padded (f32)
            pl.BlockSpec((BOT_PAD, CLS_PAD), const),           # w12 = w1@w2 (bf16)
            pl.BlockSpec((1, CLS_PAD), const),                 # b12 (f32, pads=NEG)
        ],
        out_specs=pl.BlockSpec((tm, OUT_PAD), lambda i: (i, 0)),
        out_shape=jax.ShapeDtypeStruct((b_pad, OUT_PAD), jnp.float32),
        compiler_params=pltpu.CompilerParams(
            dimension_semantics=("parallel",),   # shard batch tiles on v7x's 2 TCs
            vmem_limit_bytes=vmem_limit),
    )(x_in, w0_in, prep["b0"], prep["w1"], prep["b1"], prep["w12"], prep["b12"])

    # slice the coalesced slab back to module-visible shapes
    features = out[:bx, :BOTTLENECK_DIM]
    outputs = out[:bx, BOT_PAD:BOT_PAD + CLASS_NUM]
    softmax_outputs = out[:bx, BOT_PAD + CLS_PAD:BOT_PAD + CLS_PAD + CLASS_NUM]
    return features, outputs, softmax_outputs


if __name__ == "__main__":
    key = jax.random.PRNGKey(0)
    kx, kp, kx2 = jax.random.split(key, 3)
    params = make_params(kp)
    prep = prepare_params(params)        # one-time param prep (hoisted out of forward)
    jax.block_until_ready(prep)

    def reference(xin):
        w0, b0, w1, b1, w2, b2 = params
        pooled = jnp.mean(xin, axis=(2, 3))
        base = pooled @ w0 + b0
        feat = base @ w1 + b1
        outp = feat @ w2 + b2
        return feat, outp, jax.nn.softmax(outp, axis=-1)

    fwd = jax.jit(dann_forward)

    # small / latency path (B=2): wrapper GAP, single 8-row tile
    x = jax.random.normal(kx, (B, C, H, W), dtype=jnp.float32)
    features, outputs, softmax_outputs = fwd(x, prep)
    jax.block_until_ready((features, outputs, softmax_outputs))
    f_ref, o_ref, s_ref = reference(x)
    assert features.shape == (B, BOTTLENECK_DIM)
    assert outputs.shape == (B, CLASS_NUM)
    assert softmax_outputs.shape == (B, CLASS_NUM)
    assert jnp.allclose(features, f_ref, atol=1e-4), "features mismatch (small batch)"
    assert jnp.allclose(outputs, o_ref, atol=1e-4), "logits mismatch (small batch)"
    assert jnp.allclose(softmax_outputs, s_ref, atol=5e-4), "softmax mismatch (small batch)"
    assert jnp.allclose(jnp.sum(softmax_outputs, axis=-1), 1.0, atol=1e-4)

    # larger batch exercises the fused-GAP path, the ragged-tail pad and the
    # 2-tile parallel grid (one tile per v7x TensorCore)
    B2 = 300
    x2 = jax.random.normal(kx2, (B2, C, H, W), dtype=jnp.float32)
    f2, o2, s2 = fwd(x2, prep)
    jax.block_until_ready((f2, o2, s2))
    f2_ref, o2_ref, s2_ref = reference(x2)
    assert f2.shape == (B2, BOTTLENECK_DIM) and o2.shape == (B2, CLASS_NUM)
    assert jnp.allclose(f2, f2_ref, atol=2e-4), "features mismatch (large batch)"
    assert jnp.allclose(o2, o2_ref, atol=2e-4), "logits mismatch (large batch)"
    assert jnp.allclose(s2, s2_ref, atol=5e-4), "softmax mismatch (large batch)"

    print("KERNEL_OK")
</pallas_src>

<mosaic_0001>
module attributes {stable_mosaic.version = 11 : i64} {
  func.func @dann_kernel(%arg0: i32, %arg1: memref<8x128xbf16, #tpu.memory_space<vmem>>, %arg2: memref<128x128xbf16, #tpu.memory_space<vmem>>, %arg3: memref<1x128xf32, #tpu.memory_space<vmem>>, %arg4: memref<128x128xbf16, #tpu.memory_space<vmem>>, %arg5: memref<1x128xf32, #tpu.memory_space<vmem>>, %arg6: memref<128x128xbf16, #tpu.memory_space<vmem>>, %arg7: memref<1x128xf32, #tpu.memory_space<vmem>>, %arg8: memref<8x384xf32, #tpu.memory_space<vmem>>) attributes {dimension_semantics = [#tpu.dimension_semantics<parallel>], iteration_bounds = array<i64: 1>, scalar_prefetch = 0 : i64, scratch_operands = 0 : i64, tpu.core_type = #tpu.core_type<tc>, window_params = [{transform_indices = @transform_0, window_bounds = array<i64: 8, 128>}, {pipeline_mode = #tpu.pipeline_mode<synchronous>, transform_indices = @transform_1, window_bounds = array<i64: 128, 128>}, {pipeline_mode = #tpu.pipeline_mode<synchronous>, transform_indices = @transform_2, window_bounds = array<i64: 1, 128>}, {pipeline_mode = #tpu.pipeline_mode<synchronous>, transform_indices = @transform_3, window_bounds = array<i64: 128, 128>}, {pipeline_mode = #tpu.pipeline_mode<synchronous>, transform_indices = @transform_4, window_bounds = array<i64: 1, 128>}, {pipeline_mode = #tpu.pipeline_mode<synchronous>, transform_indices = @transform_5, window_bounds = array<i64: 128, 128>}, {pipeline_mode = #tpu.pipeline_mode<synchronous>, transform_indices = @transform_6, window_bounds = array<i64: 1, 128>}, {transform_indices = @transform_7, window_bounds = array<i64: 8, 384>}]} {
    %c0 = arith.constant 0 : index
    %c0_0 = arith.constant 0 : index
    %0 = vector.load %arg1[%c0, %c0_0] : memref<8x128xbf16, #tpu.memory_space<vmem>>, vector<8x128xbf16>
    %c0_1 = arith.constant 0 : index
    %c0_2 = arith.constant 0 : index
    %1 = vector.load %arg2[%c0_1, %c0_2] : memref<128x128xbf16, #tpu.memory_space<vmem>>, vector<128x128xbf16>
    %cst = arith.constant dense<0.000000e+00> : vector<8x128xf32>
    %2 = tpu.matmul %0, %1, %cst {dimension_numbers = #tpu.dot_dimension_numbers<[1], [0], [0], [1], [0, 0, 1, 1], [], []>} : vector<8x128xbf16>, vector<128x128xbf16>, vector<8x128xf32> -> vector<8x128xf32>
    %c0_3 = arith.constant 0 : index
    %c0_4 = arith.constant 0 : index
    %3 = vector.load %arg3[%c0_3, %c0_4] : memref<1x128xf32, #tpu.memory_space<vmem>>, vector<1x128xf32>
    %4 = vector.broadcast %3 : vector<1x128xf32> to vector<8x128xf32>
    %5 = arith.addf %2, %4 : vector<8x128xf32>
    %6 = arith.truncf %5 : vector<8x128xf32> to vector<8x128xbf16>
    %c0_5 = arith.constant 0 : index
    %c0_6 = arith.constant 0 : index
    %7 = vector.load %arg4[%c0_5, %c0_6] : memref<128x128xbf16, #tpu.memory_space<vmem>>, vector<128x128xbf16>
    %cst_7 = arith.constant dense<0.000000e+00> : vector<8x128xf32>
    %8 = tpu.matmul %6, %7, %cst_7 {dimension_numbers = #tpu.dot_dimension_numbers<[1], [0], [0], [1], [0, 0, 1, 1], [], []>} : vector<8x128xbf16>, vector<128x128xbf16>, vector<8x128xf32> -> vector<8x128xf32>
    %c0_8 = arith.constant 0 : index
    %c0_9 = arith.constant 0 : index
    %9 = vector.load %arg5[%c0_8, %c0_9] : memref<1x128xf32, #tpu.memory_space<vmem>>, vector<1x128xf32>
    %10 = vector.broadcast %9 : vector<1x128xf32> to vector<8x128xf32>
    %11 = arith.addf %8, %10 : vector<8x128xf32>
    %c0_10 = arith.constant 0 : index
    %c0_11 = arith.constant 0 : index
    %12 = vector.load %arg6[%c0_10, %c0_11] : memref<128x128xbf16, #tpu.memory_space<vmem>>, vector<128x128xbf16>
    %cst_12 = arith.constant dense<0.000000e+00> : vector<8x128xf32>
    %13 = tpu.matmul %6, %12, %cst_12 {dimension_numbers = #tpu.dot_dimension_numbers<[1], [0], [0], [1], [0, 0, 1, 1], [], []>} : vector<8x128xbf16>, vector<128x128xbf16>, vector<8x128xf32> -> vector<8x128xf32>
    %c0_13 = arith.constant 0 : index
    %c0_14 = arith.constant 0 : index
    %14 = vector.load %arg7[%c0_13, %c0_14] : memref<1x128xf32, #tpu.memory_space<vmem>>, vector<1x128xf32>
    %15 = vector.broadcast %14 : vector<1x128xf32> to vector<8x128xf32>
    %16 = arith.addf %13, %15 : vector<8x128xf32>
    %cst_15 = arith.constant dense<0xFF800000> : vector<8xf32>
    %17 = vector.multi_reduction <maximumf>, %16, %cst_15 [1] : vector<8x128xf32> to vector<8xf32>
    %18 = vector.shape_cast %17 : vector<8xf32> to vector<8x1xf32>
    %19 = vector.broadcast %18 : vector<8x1xf32> to vector<8x128xf32>
    %20 = arith.subf %16, %19 : vector<8x128xf32>
    %21 = math.exp %20 : vector<8x128xf32>
    %cst_16 = arith.constant dense<0.000000e+00> : vector<8xf32>
    %22 = vector.multi_reduction <add>, %21, %cst_16 [1] : vector<8x128xf32> to vector<8xf32>
    %23 = vector.shape_cast %22 : vector<8xf32> to vector<8x1xf32>
    %24 = vector.broadcast %23 : vector<8x1xf32> to vector<8x128xf32>
    %25 = arith.divf %21, %24 : vector<8x128xf32>
    %26 = tpu.concatenate %11, %16, %25 in 1 : vector<8x128xf32>, vector<8x128xf32>, vector<8x128xf32> -> vector<8x384xf32>
    %c0_17 = arith.constant 0 : index
    %c0_18 = arith.constant 0 : index
    %27 = vector.load %arg8[%c0_17, %c0_18] : memref<8x384xf32, #tpu.memory_space<vmem>>, vector<8x384xf32>
    tpu.vector_store %arg8[%c0_17, %c0_18], %26 {strides = array<i32>} : memref<8x384xf32, #tpu.memory_space<vmem>>, vector<8x384xf32>,
    return
  }
  func.func @transform_0(%arg0: i32) -> (i32, i32) {
    %c0_i32 = arith.constant 0 : i32
    %c0_i32_0 = arith.constant 0 : i32
    return %arg0, %c0_i32 : i32, i32
  }
  func.func @transform_1(%arg0: i32) -> (i32, i32) {
    %c0_i32 = arith.constant 0 : i32
    %c0_i32_0 = arith.constant 0 : i32
    %c0_i32_1 = arith.constant 0 : i32
    return %c0_i32, %c0_i32_0 : i32, i32
  }
  func.func @transform_2(%arg0: i32) -> (i32, i32) {
    %c0_i32 = arith.constant 0 : i32
    %c0_i32_0 = arith.constant 0 : i32
    %c0_i32_1 = arith.constant 0 : i32
    return %c0_i32, %c0_i32_0 : i32, i32
  }
  func.func @transform_3(%arg0: i32) -> (i32, i32) {
    %c0_i32 = arith.constant 0 : i32
    %c0_i32_0 = arith.constant 0 : i32
    %c0_i32_1 = arith.constant 0 : i32
    return %c0_i32, %c0_i32_0 : i32, i32
  }
  func.func @transform_4(%arg0: i32) -> (i32, i32) {
    %c0_i32 = arith.constant 0 : i32
    %c0_i32_0 = arith.constant 0 : i32
    %c0_i32_1 = arith.constant 0 : i32
    return %c0_i32, %c0_i32_0 : i32, i32
  }
  func.func @transform_5(%arg0: i32) -> (i32, i32) {
    %c0_i32 = arith.constant 0 : i32
    %c0_i32_0 = arith.constant 0 : i32
    %c0_i32_1 = arith.constant 0 : i32
    return %c0_i32, %c0_i32_0 : i32, i32
  }
  func.func @transform_6(%arg0: i32) -> (i32, i32) {
    %c0_i32 = arith.constant 0 : i32
    %c0_i32_0 = arith.constant 0 : i32
    %c0_i32_1 = arith.constant 0 : i32
    return %c0_i32, %c0_i32_0 : i32, i32
  }
  func.func @transform_7(%arg0: i32) -> (i32, i32) {
    %c0_i32 = arith.constant 0 : i32
    %c0_i32_0 = arith.constant 0 : i32
    return %arg0, %c0_i32 : i32, i32
  }
}

</mosaic_0001>

<bundles_post_ra>
// kernel: dann_forward.1
= control target key start
LH: loop header
LB: loop body
LE: loop exit
PB: predicated region body
PF: predicated region fallthrough
CT: control target
= control target key end

     0   :  { %12 = vsyncpa [#allocation3], 0  ;;  %s564_s24 = smov [#allocation2]   ;;  %s720_s0 = inlined_call_operand.vmem [shape: bf16[8,128], index: 0, kind: input, shape index: {}]   ;;  %s721_s1 = inlined_call_operand.vmem [shape: bf16[128,128], index: 1, kind: input, shape index: {}]   ;;  %s722_s2 = inlined_call_operand.vmem [shape: f32[1,128], index: 2, kind: input, shape index: {}]   ;;  %s723_s3 = inlined_call_operand.vmem [shape: bf16[128,128], index: 3, kind: input, shape index: {}]   ;;  %s724_s4 = inlined_call_operand.vmem [shape: f32[1,128], index: 4, kind: input, shape index: {}]   ;;  %s725_s5 = inlined_call_operand.hbm [shape: bf16[128,128], index: 5, kind: input, shape index: {}]   ;;  %s726_s6 = inlined_call_operand.vmem [shape: f32[1,128], index: 6, kind: input, shape index: {}]   ;;  %s727_s7 = inlined_call_operand.vmem [shape: f32[8,384], index: 7, kind: output, shape index: {}]  }
   0x1   :  { %s28_s25 = sshll.u32 %s564_s24, 4  ;;  %s540_s28 = scalar_lea.hbm %s725_s5, 1024  ;;  %s29_s25 = int_to_ptr.vmem [resolvable:$true] %s28_s25 }
   0x2   :  { %p541_p0 = scmp.ne.s32.totalorder %s725_s5, %s540_s28  ;;  %p544_p1 = scmp.lt.u32.totalorder %s540_s28, %s725_s5 }
   0x4   :  { %p546_p2 = pnand %p544_p1, %p541_p0 }
   0x6   :  { %549 = shalt.err (!%p546_p2)
}
   0x7   :  { %s550_s10 = scalar_lea.vmem %s29_s25, 1024  ;;  %p555_p4 = scmp.lt.s32.totalorder %s29_s25, %s29_s25 }
   0x8   :  { %p551_p3 = scmp.ne.s32.totalorder %s29_s25, %s550_s10  ;;  %p556_p5 = scmp.lt.s32.totalorder %s550_s10, %s550_s10 }
   0xa   :  { %p557_p6 = por %p556_p5, %p555_p4 }
   0xc   :  { %p558_p7 = pnand %p557_p6, %p551_p3 }
   0xe   :  { %561 = shalt.err (!%p558_p7)
}
   0xf   :  { %s565_s11 = smov 64   ;;  %s566_s12 = smov 4  }
  0x10   :  { %34 = dma.hbm_to_vmem [thread:$0]  %s725_s5, 1024, %s29_s25, [#allocation3], %s565_s11, %s565_s11, %s566_s12  }
  0x11   :  { %562 = dma.done.wait [#allocation3], 1024  }
  0x12   :  { %563 = vsyncadd [#allocation3], 4294966272  ;;  %v567_v0 = vmov 0.0   ;;  %vm568_vm0 = vmmov 0   ;;  %v512_v1 = vld [vmem:[%s721_s1] sm:$0xff]   ;;  %v513_v2 = vld [vmem:[%s721_s1 + $0x8] sm:$0xff]  }
  0x13   :  { %447 = vmatprep.subr.bf16.mxu0 %v567_v0  ;;  %463 = vmatprep.mubr.msk.bf16.mxu0 %vm568_vm0, %v567_v0  ;;  %v514_v3 = vld [vmem:[%s721_s1 + $0x10] sm:$0xff]   ;;  %v520_v4 = vld [vmem:[%s723_s3] sm:$0xff]   ;;  %v515_v5 = vld [vmem:[%s721_s1 + $0x18] sm:$0xff]  }
  0x14   :  { %467 = vmatprep.subr.bf16.mxu1 %v567_v0  ;;  %483 = vmatprep.mubr.msk.bf16.mxu1 %vm568_vm0, %v567_v0  ;;  %v522_v6 = vld [vmem:[%s723_s3 + $0x8] sm:$0xff]   ;;  %v516_v7 = vld [vmem:[%s721_s1 + $0x20] sm:$0xff]   ;;  %v524_v8 = vld [vmem:[%s723_s3 + $0x10] sm:$0xff]  }
  0x15   :  { %448 = vmatpush3.bf16.msra.mxu0 %v512_v1  ;;  %468 = vmatpush3.bf16.msra.mxu1 %v520_v4  ;;  %v517_v9 = vld [vmem:[%s721_s1 + $0x28] sm:$0xff]   ;;  %v526_v10 = vld [vmem:[%s723_s3 + $0x18] sm:$0xff]   ;;  %v518_v11 = vld [vmem:[%s721_s1 + $0x30] sm:$0xff]  }
  0x16   :  { %449 = vmatprep.subr.bf16.mxu0 %v567_v0  ;;  %469 = vmatprep.subr.bf16.mxu1 %v567_v0  ;;  %v528_v12 = vld [vmem:[%s723_s3 + $0x20] sm:$0xff]   ;;  %v519_v13 = vld [vmem:[%s721_s1 + $0x38] sm:$0xff]   ;;  %v530_v14 = vld [vmem:[%s723_s3 + $0x28] sm:$0xff]  }
  0x17   :  { %v41_v15 = vld [vmem:[%s720_s0] sm:$0xf]  ;;  %v532_v17 = vld [vmem:[%s723_s3 + $0x30] sm:$0xff]   ;;  %v523_v18 = vld [vmem:[#allocation2 + $0x8] sm:$0xff]  }
  0x18   :  { %v521_v16 = vld [vmem:[#allocation2] sm:$0xff]   ;;  %v525_v19 = vld [vmem:[#allocation2 + $0x10] sm:$0xff]   ;;  %v527_v20 = vld [vmem:[#allocation2 + $0x18] sm:$0xff]  }
  0x19   :  { %450 = vmatpush3.bf16.msra.mxu0 %v513_v2  ;;  %470 = vmatpush3.bf16.msra.mxu1 %v522_v6  ;;  %v529_v21 = vld [vmem:[#allocation2 + $0x20] sm:$0xff]   ;;  %v531_v22 = vld [vmem:[#allocation2 + $0x28] sm:$0xff]   ;;  %v533_v23 = vld [vmem:[#allocation2 + $0x30] sm:$0xff]  }
  0x1a   :  { %451 = vmatprep.subr.bf16.mxu0 %v567_v0  ;;  %471 = vmatprep.subr.bf16.mxu1 %v567_v0  ;;  %v534_v24 = vld [vmem:[%s723_s3 + $0x38] sm:$0xff]   ;;  %v393_v26 = vld [vmem:[%s722_s2] ss:$0 sm:$0xff] }
  0x1b   :  { %v535_v25 = vld [vmem:[#allocation2 + $0x38] sm:$0xff]   ;;  %v402_v33 = vld [vmem:[%s724_s4] ss:$0 sm:$0xff] }
  0x1c   :  { %v411_v34 = vld [vmem:[%s726_s6] ss:$0 sm:$0xff] }
  0x1d   :  { %452 = vmatpush3.bf16.msra.mxu0 %v514_v3  ;;  %472 = vmatpush3.bf16.msra.mxu1 %v524_v8 }
  0x1e   :  { %453 = vmatprep.subr.bf16.mxu0 %v567_v0  ;;  %473 = vmatprep.subr.bf16.mxu1 %v567_v0 }
  0x21   :  { %454 = vmatpush3.bf16.msra.mxu0 %v515_v5  ;;  %474 = vmatpush3.bf16.msra.mxu1 %v526_v10 }
  0x22   :  { %455 = vmatprep.subr.bf16.mxu0 %v567_v0  ;;  %475 = vmatprep.subr.bf16.mxu1 %v567_v0 }
  0x25   :  { %456 = vmatpush3.bf16.msra.mxu0 %v516_v7  ;;  %476 = vmatpush3.bf16.msra.mxu1 %v528_v12 }
  0x26   :  { %457 = vmatprep.subr.bf16.mxu0 %v567_v0  ;;  %477 = vmatprep.subr.bf16.mxu1 %v567_v0 }
  0x29   :  { %458 = vmatpush3.bf16.msra.mxu0 %v517_v9  ;;  %478 = vmatpush3.bf16.msra.mxu1 %v530_v14 }
  0x2a   :  { %459 = vmatprep.subr.bf16.mxu0 %v567_v0  ;;  %479 = vmatprep.subr.bf16.mxu1 %v567_v0 }
  0x2d   :  { %460 = vmatpush3.bf16.msra.mxu0 %v518_v11  ;;  %480 = vmatpush3.bf16.msra.mxu1 %v532_v17 }
  0x2e   :  { %461 = vmatprep.subr.bf16.mxu0 %v567_v0  ;;  %481 = vmatprep.subr.bf16.mxu1 %v567_v0 }
  0x31   :  { %462 = vmatpush3.bf16.msra.mxu0 %v519_v13  ;;  %482 = vmatpush3.bf16.msra.mxu1 %v534_v24 }
  0x32   :  { %487 = vmatprep.subr.bf16.mxu0 %v567_v0 }
  0x34   :  { %464 = vmatmul.mubr.bf16.vlgmr.msra.gmra.mrb[0].mxu0 %v41_v15 }
  0x35   :  { %488 = vmatpush3.bf16.msra.mxu0 %v521_v16  ;;  %503 = vmatprep.mubr.msk.bf16.mxu0 %vm568_vm0, %v567_v0 }
  0x36   :  { %489 = vmatprep.subr.bf16.mxu0 %v567_v0 }
  0x39   :  { %490 = vmatpush3.bf16.msra.mxu0 %v523_v18 }
  0x3a   :  { %491 = vmatprep.subr.bf16.mxu0 %v567_v0 }
  0x3d   :  { %492 = vmatpush3.bf16.msra.mxu0 %v525_v19 }
  0x3e   :  { %493 = vmatprep.subr.bf16.mxu0 %v567_v0 }
  0x41   :  { %494 = vmatpush3.bf16.msra.mxu0 %v527_v20 }
  0x42   :  { %495 = vmatprep.subr.bf16.mxu0 %v567_v0 }
  0x45   :  { %496 = vmatpush3.bf16.msra.mxu0 %v529_v21 }
  0x46   :  { %497 = vmatprep.subr.bf16.mxu0 %v567_v0 }
  0x49   :  { %498 = vmatpush3.bf16.msra.mxu0 %v531_v22 }
  0x4a   :  { %499 = vmatprep.subr.bf16.mxu0 %v567_v0 }
  0x4d   :  { %500 = vmatpush3.bf16.msra.mxu0 %v533_v23 }
  0x4e   :  { %501 = vmatprep.subr.bf16.mxu0 %v567_v0 }
  0x51   :  { %502 = vmatpush3.bf16.msra.mxu0 %v535_v25 }
 0x107   :  { %v147_v27 = vpop.f32.mrb[0].mxu0 }
 0x108   :  { %v148_v28 = vadd.f32 %v393_v26, %v147_v27  ;;  %v465_v29 = vpop.f32.mrb[1].mxu0 }
 0x109   :  { %v150_v30 = vpop.f32.mrb[2].mxu0 }
 0x10a   :  { %v153_v31 = vpack.c.bf16 %v148_v28, %v148_v28  ;;  %v466_v32 = vpop.f32.mrb[3].mxu0 }
 0x10c   :  { %484 = vmatmul.mubr.bf16.vlgmr.msra.gmra.mrb[0].mxu1 %v153_v31  ;;  %504 = vmatmul.mubr.bf16.vlgmr.msra.gmra.mrb[4].mxu0 %v153_v31 }
 0x1df   :  { %v259_v35 = vpop.f32.mrb[0].mxu1  ;;  %v370_v36 = vpop.f32.mrb[4].mxu0 }
 0x1e0   :  { %v260_v37 = vadd.f32 %v402_v33, %v259_v35  ;;  %v371_v38 = vadd.f32 %v411_v34, %v370_v36  ;;  %v485_v39 = vpop.f32.mrb[1].mxu1  ;;  %v505_v40 = vpop.f32.mrb[5].mxu0 }
 0x1e1   :  { %v262_v41 = vpop.f32.mrb[2].mxu1  ;;  %v373_v42 = vpop.f32.mrb[6].mxu0 }
 0x1e2   :  { %385 = vst [vmem:[%s727_s7] sm:$0xff] %v260_v37  ;;  %386 = vst [vmem:[%s727_s7 + $0x8] sm:$0xff] %v371_v38  ;;  %v486_v43 = vpop.f32.mrb[3].mxu1  ;;  %376 = vmax.xlane.f32.xlu0 %v371_v38  ;;  %v506_v44 = vpop.f32.mrb[7].mxu0 }
 0x26f   :  { %v377_v45 = vpop.xlane.xlu0 %376 }
 0x270   :  { %v378_v46 = vsub.f32 %v371_v38, %v377_v45 }
 0x272   :  { %v379_v47 = vmul.f32 1.442695, %v378_v46 }
 0x274   :  { %536 = vpow2.f32 %v379_v47 }
 0x27e   :  { %v537_v48 = vpop.eup %536 }
 0x27f   :  { %381 = vadd.xlane.f32.xlu0 %v537_v48 }
 0x30c   :  { %v382_v49 = vpop.xlane.xlu0 %381 }
 0x30d   :  { %538 = vrcp.f32 %v382_v49 }
 0x317   :  { %v539_v50 = vpop.eup %538 }
 0x318   :  { %v384_v51 = vmul.f32 %v539_v50, %v537_v48 }
 0x31a   :  { %387 = vst [vmem:[%s727_s7 + $0x10] sm:$0xff] %v384_v51 }
 0x31b   :  { %392 = vsyncpa [#allocation3], 1 }

</bundles_post_ra>
